<compile_context>
chip_gen: v7x
topology: tpu7x:2x2x1
jax: 0.10.0
libtpu: 0.0.40
codegen_flags: <defaults>
</compile_context>

<pallas_src>
import functools
import math

import jax
import jax.numpy as jnp
from jax.experimental import pallas as pl
from jax.experimental.pallas import tpu as pltpu


def _round_up(a, b):
    return (a + b - 1) // b * b


# -----------------------------------------------------------------------------
# Kernel 1: fused projection  x @ [W | W_res]  and per-head alpha reductions
# -----------------------------------------------------------------------------
def _projection_kernel(x_ref, w_ref, att_ref, out_ref, *, hc, n_heads, mxu_dtype):
    x = x_ref[...].astype(mxu_dtype)                          # [TM, F]
    w = w_ref[...].astype(mxu_dtype)                          # [F, 2*HC]
    # fused lin(x) and lin_residual(x): one MXU matmul, f32 accumulation
    xwres = jnp.dot(x, w, preferred_element_type=jnp.float32)          # [TM, 2*HC]
    # all heads' alpha_l / alpha_r in one MXU matmul against a block-diagonal
    # attention matrix (replaces 2*H narrow cross-lane XLU reductions)
    alphas = jnp.dot(xwres[:, :hc].astype(mxu_dtype),
                     att_ref[...].astype(mxu_dtype),
                     preferred_element_type=jnp.float32)                # [TM, 2*H]
    tm = xwres.shape[0]
    pad = out_ref.shape[1] - (2 * hc + 2 * n_heads)
    pieces = [xwres, alphas]
    if pad > 0:
        pieces.append(jnp.zeros((tm, pad), jnp.float32))
    # single lane-dense 128-wide store (no masked vst.msk partial stores)
    out_ref[...] = jnp.concatenate(pieces, axis=-1)


# -----------------------------------------------------------------------------
# Kernel 2: online-softmax attention + MXU aggregation
#   grid = (dst blocks [parallel], src blocks [arbitrary, innermost])
# -----------------------------------------------------------------------------
def _attention_kernel(xw_ref, alT_ref, res_ref, ar_ref, ew_ref, out_ref,
                      acc_ref, m_ref, l_ref, *, n_heads, head_dim, mxu_dtype):
    hc = n_heads * head_dim
    k = pl.program_id(1)

    @pl.when(k == 0)
    def _():
        acc_ref[...] = jnp.zeros_like(acc_ref)
        m_ref[...] = jnp.full_like(m_ref, -1e30)
        l_ref[...] = jnp.zeros_like(l_ref)

    ew_raw = ew_ref[...]                                      # [TM, TK] stream dtype
    ew = ew_raw.astype(jnp.float32)
    # additive adjacency mask derived from the single edge-weight stream
    # (real edges must carry nonzero weight)
    maskadd = jnp.where(ew_raw != 0, 0.0, -1e30).astype(jnp.float32)   # [TM, TK]
    ar = ar_ref[...]                                          # [TM, H]  f32
    xw = xw_ref[...]                                          # [TK, HC] already mxu dtype

    # static head loop (H small); per-head results written straight to scratch
    for h in range(n_heads):
        al_row = alT_ref[h:h + 1, :]                          # [1, TK] alpha_l over src
        s = ew * (ar[:, h:h + 1] + al_row)                    # [TM, TK]
        s = jnp.maximum(s, 0.2 * s)                           # LeakyReLU(0.2), 2 VPU ops
        s = s + maskadd                                       # off-edge -> -1e30
        m_old = m_ref[:, h:h + 1]                             # [TM, 1]
        m_new = jnp.maximum(m_old, jnp.max(s, axis=1, keepdims=True))
        corr = jnp.exp(m_old - m_new)                         # online-softmax rescale
        p = jnp.exp(s - m_new)                                # unnormalized probs
        l_ref[:, h:h + 1] = corr * l_ref[:, h:h + 1] + jnp.sum(p, axis=1, keepdims=True)
        # deferred normalization: unnormalized p feeds the MXU (f32 accumulation)
        acc_ref[:, h * head_dim:(h + 1) * head_dim] = (
            corr * acc_ref[:, h * head_dim:(h + 1) * head_dim]
            + jnp.dot(p.astype(mxu_dtype), xw[:, h * head_dim:(h + 1) * head_dim],
                      preferred_element_type=jnp.float32))
        m_ref[:, h:h + 1] = m_new

    @pl.when(k == pl.num_programs(1) - 1)
    def _():
        m = m_ref[...]                                        # [TM, H]
        l = l_ref[...]                                        # [TM, H]
        # rows with no in-edges (incl. padded rows): m == -1e30 -> zero output
        inv = jnp.where(m > -1e29, 1.0 / l, 0.0)              # tiny [TM, H]
        acc = acc_ref[...]                                    # [TM, HC]
        out = jnp.concatenate(
            [acc[:, h * head_dim:(h + 1) * head_dim] * inv[:, h:h + 1]
             for h in range(n_heads)], axis=-1)               # [TM, HC]
        out = jnp.where(out > 0, out, jnp.exp(jnp.minimum(out, 0.0)) - 1.0)   # ELU
        out = out + res_ref[...]                              # residual
        tm = out.shape[0]
        pad = out_ref.shape[1] - (hc + 2 * n_heads)
        pieces = [out, m, l]                                  # [out | max_h | denom_h]
        if pad > 0:
            pieces.append(jnp.zeros((tm, pad), jnp.float32))
        # single lane-dense 128-wide store, once per dst block
        out_ref[...] = jnp.concatenate(pieces, axis=-1)


# -----------------------------------------------------------------------------
# Wrapper
# -----------------------------------------------------------------------------
def structural_attention_forward(x, edge_index, edge_attr, params, *,
                                 mxu_dtype=jnp.bfloat16,
                                 block_rows=128, block_src=128):
    """x: [N, F] f32; edge_index: [2, E] int32 (row0=src, row1=dst);
    edge_attr: [E] f32, nonzero on real edges.
    Returns (out [N, H*C] f32, coefficients [E, H] f32)."""
    N, F = x.shape
    W, Wres = params["W"], params["W_res"]                    # [F, H*C]
    att_l, att_r = params["att_l"], params["att_r"]           # [H, C]
    H, C = att_l.shape
    HC = H * C

    lcm = block_rows * block_src // math.gcd(block_rows, block_src)
    Np = _round_up(max(N, 1), lcm)                            # pad nodes
    src, dst = edge_index[0], edge_index[1]

    # --- Kernel 1 inputs ---
    x_p = jnp.zeros((Np, F), jnp.float32).at[:N].set(x)
    w_cat = jnp.concatenate([W, Wres], axis=1)                # [F, 2*HC] fused weights
    att_bd = jnp.zeros((HC, 2 * H), jnp.float32)              # block-diag [alpha_l|alpha_r]
    for h in range(H):
        att_bd = att_bd.at[h * C:(h + 1) * C, h].set(att_l[h])
        att_bd = att_bd.at[h * C:(h + 1) * C, H + h].set(att_r[h])

    PROJ_W = _round_up(2 * HC + 2 * H, 128)
    proj = pl.pallas_call(
        functools.partial(_projection_kernel, hc=HC, n_heads=H, mxu_dtype=mxu_dtype),
        grid=(Np // block_rows,),
        in_specs=[
            pl.BlockSpec((block_rows, F), lambda i: (i, 0)),
            pl.BlockSpec((F, 2 * HC), lambda i: (0, 0)),
            pl.BlockSpec((HC, 2 * H), lambda i: (0, 0)),
        ],
        out_specs=pl.BlockSpec((block_rows, PROJ_W), lambda i: (i, 0)),
        out_shape=jax.ShapeDtypeStruct((Np, PROJ_W), jnp.float32),
        compiler_params=pltpu.CompilerParams(dimension_semantics=("parallel",)),
    )(x_p, w_cat, att_bd)

    xw_full = proj[:, :HC]                                    # [Np, HC]
    res_full = proj[:, HC:2 * HC]                             # [Np, HC]
    al = proj[:, 2 * HC:2 * HC + H]                           # [Np, H] alpha_l
    ar = proj[:, 2 * HC + H:2 * HC + 2 * H]                   # [Np, H] alpha_r

    # pre-cast streamed operands (halves bytes on bf16 path, no per-step cast)
    xw_mxu = xw_full.astype(mxu_dtype)
    al_T = al.T                                               # [H, Np] (lane axis = src)

    # single dense [dst, src] edge-weight stream in the stream/MXU dtype;
    # the adjacency mask is derived in-kernel from ew != 0
    ew = jnp.zeros((Np, Np), mxu_dtype).at[dst, src].set(edge_attr.astype(mxu_dtype))

    # NOTE: block_src can be raised to 512-2048 on v5e/v6e (bigger tiles -> closer
    # to HBM roofline); VMEM per step stays O(block_rows*block_src), independent
    # of N, so the default scoped VMEM limit suffices on all of v5e/v6e/v7x.
    OUT_W = _round_up(HC + 2 * H, 128)
    out_slab = pl.pallas_call(
        functools.partial(_attention_kernel, n_heads=H, head_dim=C, mxu_dtype=mxu_dtype),
        grid=(Np // block_rows, Np // block_src),
        in_specs=[
            pl.BlockSpec((block_src, HC), lambda i, k: (k, 0)),          # x_h (src block)
            pl.BlockSpec((H, block_src), lambda i, k: (0, k)),           # alpha_l^T
            pl.BlockSpec((block_rows, HC), lambda i, k: (i, 0)),         # residual (dst)
            pl.BlockSpec((block_rows, H), lambda i, k: (i, 0)),          # alpha_r (dst)
            pl.BlockSpec((block_rows, block_src), lambda i, k: (i, k)),  # edge weights
        ],
        out_specs=pl.BlockSpec((block_rows, OUT_W), lambda i, k: (i, 0)),
        out_shape=jax.ShapeDtypeStruct((Np, OUT_W), jnp.float32),
        scratch_shapes=[
            pltpu.VMEM((block_rows, HC), jnp.float32),   # online-softmax accumulator
            pltpu.VMEM((block_rows, H), jnp.float32),    # running max
            pltpu.VMEM((block_rows, H), jnp.float32),    # running denom
        ],
        compiler_params=pltpu.CompilerParams(
            dimension_semantics=("parallel", "arbitrary")),
    )(xw_mxu, al_T, res_full, ar, ew)

    out = out_slab[:N, :HC]
    m_n = out_slab[:, HC:HC + H]                              # per-dst softmax row max
    d_n = out_slab[:, HC + H:HC + 2 * H]                      # per-dst softmax denom

    # per-edge coefficients, O(E*H), consistent with the kernel's internal softmax
    ew_e = edge_attr.astype(mxu_dtype).astype(jnp.float32)    # match kernel stream dtype
    a_e = ew_e[:, None] * (al[src] + ar[dst])                 # [E, H]
    a_e = jnp.maximum(a_e, 0.2 * a_e)                         # LeakyReLU(0.2)
    coefficients = jnp.exp(a_e - m_n[dst]) / d_n[dst]
    return out, coefficients


# -----------------------------------------------------------------------------
# Pure-JAX reference (segment ops) for correctness check
# -----------------------------------------------------------------------------
def reference_forward(x, edge_index, edge_attr, params):
    N, F = x.shape
    W, Wres = params["W"], params["W_res"]
    att_l, att_r = params["att_l"], params["att_r"]
    H, C = att_l.shape
    src, dst = edge_index[0], edge_index[1]

    xw = x @ W
    xh = xw.reshape(N, H, C)
    al = jnp.sum(xh * att_l[None], axis=-1)                   # [N, H]
    ar = jnp.sum(xh * att_r[None], axis=-1)                   # [N, H]
    alpha = al[src] + ar[dst]                                 # [E, H]
    alpha = edge_attr[:, None] * alpha
    alpha = jnp.where(alpha > 0, alpha, 0.2 * alpha)
    amax = jax.ops.segment_max(alpha, dst, num_segments=N)
    e = jnp.exp(alpha - amax[dst])
    denom = jax.ops.segment_sum(e, dst, num_segments=N)
    coeff = e / denom[dst]
    out = jax.ops.segment_sum(xh[src] * coeff[:, :, None], dst, num_segments=N)
    out = jnp.where(out > 0, out, jnp.expm1(out)).reshape(N, H * C)
    out = out + x @ Wres
    return out, coeff


# -----------------------------------------------------------------------------
# Main
# -----------------------------------------------------------------------------
if __name__ == "__main__":
    input_dim = 16
    output_dim = 32
    n_heads = 4
    head_dim = output_dim // n_heads          # C = 8

    key = jax.random.PRNGKey(0)
    k_w, k_wr, k_al, k_ar, k_rest = jax.random.split(key, 5)

    def xavier(k, shape):
        fan_in, fan_out = shape[-2], shape[-1]
        bound = math.sqrt(6.0 / (fan_in + fan_out))
        return jax.random.uniform(k, shape, jnp.float32, -bound, bound)

    params = {
        "W": xavier(k_w, (input_dim, n_heads * head_dim)),
        "W_res": xavier(k_wr, (input_dim, n_heads * head_dim)),
        "att_l": xavier(k_al, (n_heads, head_dim)),
        "att_r": xavier(k_ar, (n_heads, head_dim)),
        # sim_weight_linear is training-only (selective_sampling) -> not needed here.
    }

    def build_graph(kx, kw_, N, ks, skip_mod=None):
        x = jax.random.normal(kx, (N, input_dim), jnp.float32)
        src_list, dst_list = [], []
        for i in range(N):
            if skip_mod is not None and i % skip_mod == 0:
                continue                      # node i has no in-edges
            for k in ks:
                src_list.append((i + k) % N)
                dst_list.append(i)
        assert len(set(zip(src_list, dst_list))) == len(src_list)  # no duplicate pairs
        edge_index = jnp.array([src_list, dst_list], dtype=jnp.int32)
        E = edge_index.shape[1]
        edge_attr = jax.random.uniform(kw_, (E,), jnp.float32, 0.5, 1.5)  # nonzero
        return x, edge_index, edge_attr

    def run_case(x, edge_index, edge_attr):
        N = x.shape[0]
        E = edge_index.shape[1]
        ref_out, ref_coeff = reference_forward(x, edge_index, edge_attr, params)

        # f32 MXU path: tight check
        out32, coeff32 = structural_attention_forward(
            x, edge_index, edge_attr, params, mxu_dtype=jnp.float32)
        out32 = jax.block_until_ready(out32)
        coeff32 = jax.block_until_ready(coeff32)
        assert out32.shape == (N, n_heads * head_dim)
        assert coeff32.shape == (E, n_heads)
        assert jnp.allclose(out32, ref_out, atol=1e-3, rtol=1e-3)
        assert jnp.allclose(coeff32, ref_coeff, atol=1e-3, rtol=1e-3)

        # bf16 MXU path (default, recommended on v6e/v7x): loose check
        out16, coeff16 = structural_attention_forward(
            x, edge_index, edge_attr, params, mxu_dtype=jnp.bfloat16)
        out16 = jax.block_until_ready(out16)
        coeff16 = jax.block_until_ready(coeff16)
        assert out16.shape == (N, n_heads * head_dim)
        assert coeff16.shape == (E, n_heads)
        assert jnp.allclose(out16, ref_out, atol=1e-1, rtol=1e-1)
        assert jnp.allclose(coeff16, ref_coeff, atol=1e-1, rtol=1e-1)

    # Case 1: small graph (single dst/src block; mirrors the module's typical sizes)
    k1x, k1w, k2x, k2w = jax.random.split(k_rest, 4)
    x1, ei1, ea1 = build_graph(k1x, k1w, N=16, ks=(1, 3, 5))
    run_case(x1, ei1, ea1)

    # Case 2: larger graph (3x3 grid -> exercises multi-block online softmax,
    # megacore-parallel dst axis, and dst nodes with zero in-edges)
    x2, ei2, ea2 = build_graph(k2x, k2w, N=300, ks=(1, 3, 5, 7, 101), skip_mod=7)
    run_case(x2, ei2, ea2)

    print("KERNEL_OK")
</pallas_src>

<mosaic_0001>
module attributes {stable_mosaic.version = 11 : i64} {
  func.func @_projection_kernel(%arg0: i32, %arg1: memref<128x16xf32, #tpu.memory_space<vmem>>, %arg2: memref<16x64xf32, #tpu.memory_space<vmem>>, %arg3: memref<32x8xf32, #tpu.memory_space<vmem>>, %arg4: memref<128x128xf32, #tpu.memory_space<vmem>>) attributes {dimension_semantics = [#tpu.dimension_semantics<parallel>], iteration_bounds = array<i64: 1>, scalar_prefetch = 0 : i64, scratch_operands = 0 : i64, tpu.core_type = #tpu.core_type<tc>, window_params = [{transform_indices = @transform_0, window_bounds = array<i64: 128, 16>}, {pipeline_mode = #tpu.pipeline_mode<synchronous>, transform_indices = @transform_1, window_bounds = array<i64: 16, 64>}, {pipeline_mode = #tpu.pipeline_mode<synchronous>, transform_indices = @transform_2, window_bounds = array<i64: 32, 8>}, {transform_indices = @transform_3, window_bounds = array<i64: 128, 128>}]} {
    %c0 = arith.constant 0 : index
    %c0_0 = arith.constant 0 : index
    %0 = vector.load %arg1[%c0, %c0_0] : memref<128x16xf32, #tpu.memory_space<vmem>>, vector<128x16xf32>
    %c0_1 = arith.constant 0 : index
    %c0_2 = arith.constant 0 : index
    %1 = vector.load %arg2[%c0_1, %c0_2] : memref<16x64xf32, #tpu.memory_space<vmem>>, vector<16x64xf32>
    %cst = arith.constant dense<0.000000e+00> : vector<128x64xf32>
    %2 = tpu.matmul %0, %1, %cst {dimension_numbers = #tpu.dot_dimension_numbers<[1], [0], [0], [1], [0, 0, 1, 1], [], []>} : vector<128x16xf32>, vector<16x64xf32>, vector<128x64xf32> -> vector<128x64xf32>
    %3 = vector.extract_strided_slice %2 {offsets = [0, 0], sizes = [128, 32], strides = [1, 1]} : vector<128x64xf32> to vector<128x32xf32>
    %c0_3 = arith.constant 0 : index
    %c0_4 = arith.constant 0 : index
    %4 = vector.load %arg3[%c0_3, %c0_4] : memref<32x8xf32, #tpu.memory_space<vmem>>, vector<32x8xf32>
    %cst_5 = arith.constant dense<0.000000e+00> : vector<128x8xf32>
    %5 = tpu.matmul %3, %4, %cst_5 {dimension_numbers = #tpu.dot_dimension_numbers<[1], [0], [0], [1], [0, 0, 1, 1], [], []>} : vector<128x32xf32>, vector<32x8xf32>, vector<128x8xf32> -> vector<128x8xf32>
    %cst_6 = arith.constant 0.000000e+00 : f32
    %6 = vector.broadcast %cst_6 : f32 to vector<128x56xf32>
    %7 = tpu.concatenate %2, %5, %6 in 1 : vector<128x64xf32>, vector<128x8xf32>, vector<128x56xf32> -> vector<128x128xf32>
    %c0_7 = arith.constant 0 : index
    %c0_8 = arith.constant 0 : index
    %8 = vector.load %arg4[%c0_7, %c0_8] : memref<128x128xf32, #tpu.memory_space<vmem>>, vector<128x128xf32>
    tpu.vector_store %arg4[%c0_7, %c0_8], %7 {strides = array<i32>} : memref<128x128xf32, #tpu.memory_space<vmem>>, vector<128x128xf32>,
    return
  }
  func.func @transform_0(%arg0: i32) -> (i32, i32) {
    %c0_i32 = arith.constant 0 : i32
    %c0_i32_0 = arith.constant 0 : i32
    return %arg0, %c0_i32 : i32, i32
  }
  func.func @transform_1(%arg0: i32) -> (i32, i32) {
    %c0_i32 = arith.constant 0 : i32
    %c0_i32_0 = arith.constant 0 : i32
    %c0_i32_1 = arith.constant 0 : i32
    return %c0_i32, %c0_i32_0 : i32, i32
  }
  func.func @transform_2(%arg0: i32) -> (i32, i32) {
    %c0_i32 = arith.constant 0 : i32
    %c0_i32_0 = arith.constant 0 : i32
    %c0_i32_1 = arith.constant 0 : i32
    return %c0_i32, %c0_i32_0 : i32, i32
  }
  func.func @transform_3(%arg0: i32) -> (i32, i32) {
    %c0_i32 = arith.constant 0 : i32
    %c0_i32_0 = arith.constant 0 : i32
    return %arg0, %c0_i32 : i32, i32
  }
}

</mosaic_0001>

<bundles_post_ra>
// kernel: tpu_custom_call.1
= control target key start
LH: loop header
LB: loop body
LE: loop exit
PB: predicated region body
PF: predicated region fallthrough
CT: control target
= control target key end

     0   :  { %vm33_vm0 = vcmask 130048   ;;  %s971_s0 = inlined_call_operand.vmem [shape: f32[128,16], index: 0, kind: input, shape index: {}]   ;;  %s972_s1 = inlined_call_operand.vmem [shape: f32[16,64], index: 1, kind: input, shape index: {}]   ;;  %s973_s2 = inlined_call_operand.vmem [shape: f32[32,8], index: 2, kind: input, shape index: {}]   ;;  %s974_s3 = inlined_call_operand.hbm [shape: f32[128,128], index: 3, kind: output, shape index: {}]  }
   0x1   :  { %v31_v0 = vld [vmem:[%s972_s1] sm:$0xff]  ;;  %v32_v1 = vld [vmem:[%s972_s1 + $0x8] sm:$0xff]  ;;  %v17_v5 = vld [vmem:[%s971_s0 + $0x10] sm:$0xff] }
   0x2   :  { %v15_v2 = vld [vmem:[%s971_s0] sm:$0xff]  ;;  %v685_v3 = vpack.c.bf16 %v32_v1, %v31_v0  ;;  %v16_v4 = vld [vmem:[%s971_s0 + $0x8] sm:$0xff]  ;;  %v229_v8 = vld [vmem:[%s973_s2 + $0x10] sm:$0xff] }
   0x3   :  { %629 = vmatprep.mubr.msk.f32.mxu0 %vm33_vm0, %v15_v2  ;;  %v227_v6 = vld [vmem:[%s973_s2] sm:$0xff]  ;;  %v228_v7 = vld [vmem:[%s973_s2 + $0x8] sm:$0xff]  ;;  %v230_v10 = vld [vmem:[%s973_s2 + $0x18] sm:$0xff] }
   0x4   :  { %686 = vmatprep.subr.bf16.mxu0 %v685_v3  ;;  %v689_v9 = vpack.c.bf16 %v228_v7, %v227_v6 }
   0x5   :  { %688 = vmatpush3.bf16.msra.mxu0 %v685_v3 }
   0x8   :  { %630 = vmatmul.mubr.msk.f32.vlgmr.msra.gmra.mrb[0].mxu0 %vm33_vm0, %v16_v4 }
   0x9   :  { %8 = vsyncpa [#allocation3], 0  ;;  %632 = vmatprep.mubr.msk.f32.mxu0 %vm33_vm0, %v17_v5  ;;  %v18_v11 = vld [vmem:[%s971_s0 + $0x18] sm:$0xff]  ;;  %v693_v12 = vpack.c.bf16 %v230_v10, %v229_v8  ;;  %v19_v13 = vld [vmem:[%s971_s0 + $0x20] sm:$0xff]  ;;  %690 = vmatprep.subr.bf16.mxu1 %v689_v9  ;;  %vm231_vm1 = vcmask 261120   ;;  %vm489_vm2 = vcmask 523264  }
   0xa   :  { %692 = vmatpush3.bf16.msra.mxu1 %v689_v9  ;;  %v20_v14 = vld [vmem:[%s971_s0 + $0x28] sm:$0xff]  ;;  %v21_v15 = vld [vmem:[%s971_s0 + $0x30] sm:$0xff]  ;;  %v22_v16 = vld [vmem:[%s971_s0 + $0x38] sm:$0xff]  ;;  %vm506_vm3 = vcmask 588800   ;;  %s726_s26 = smov [#allocation2]  }
   0xb   :  { %694 = vmatprep.subr.bf16.mxu1 %v693_v12  ;;  %v23_v17 = vld [vmem:[%s971_s0 + $0x40] sm:$0xff]  ;;  %v24_v18 = vld [vmem:[%s971_s0 + $0x48] sm:$0xff]  ;;  %v25_v19 = vld [vmem:[%s971_s0 + $0x50] sm:$0xff]  ;;  %s544_s27 = sshll.u32 %s726_s26, 4  ;;  %s545_s27 = int_to_ptr.vmem [resolvable:$true] %s544_s27 }
   0xc   :  { %633 = vmatmul.mubr.msk.f32.gmra.mrb[2].mxu0 %vm33_vm0, %v18_v11  ;;  %v26_v20 = vld [vmem:[%s971_s0 + $0x58] sm:$0xff]  ;;  %v27_v21 = vld [vmem:[%s971_s0 + $0x60] sm:$0xff]  ;;  %v28_v22 = vld [vmem:[%s971_s0 + $0x68] sm:$0xff]  ;;  %s701_s28 = scalar_lea.vmem %s545_s27, 2048  ;;  %p706_p1 = scmp.lt.s32.totalorder %s545_s27, %s545_s27 }
   0xd   :  { %635 = vmatprep.mubr.msk.f32.mxu0 %vm33_vm0, %v19_v13  ;;  %v29_v23 = vld [vmem:[%s971_s0 + $0x70] sm:$0xff]  ;;  %v30_v24 = vld [vmem:[%s971_s0 + $0x78] sm:$0xff]  ;;  %s725_s0 = smov 64   ;;  %p702_p0 = scmp.ne.s32.totalorder %s545_s27, %s701_s28 }
   0xe   :  { %696 = vmatpush3.bf16.msra.mxu1 %v693_v12  ;;  %p707_p2 = scmp.lt.s32.totalorder %s701_s28, %s701_s28 }
  0x10   :  { %636 = vmatmul.mubr.msk.f32.gmra.mrb[4].mxu0 %vm33_vm0, %v20_v14  ;;  %p708_p3 = por %p707_p2, %p706_p1 }
  0x11   :  { %638 = vmatprep.mubr.msk.f32.mxu0 %vm33_vm0, %v21_v15 }
  0x12   :  { %p709_p4 = pnand %p708_p3, %p702_p0 }
  0x14   :  { %639 = vmatmul.mubr.msk.f32.gmra.mrb[6].mxu0 %vm33_vm0, %v22_v16 }
  0x15   :  { %641 = vmatprep.mubr.msk.f32.mxu0 %vm33_vm0, %v23_v17 }
  0x18   :  { %642 = vmatmul.mubr.msk.f32.gmra.mrb[8].mxu0 %vm33_vm0, %v24_v18 }
  0x19   :  { %644 = vmatprep.mubr.msk.f32.mxu0 %vm33_vm0, %v25_v19 }
  0x1c   :  { %645 = vmatmul.mubr.msk.f32.gmra.mrb[10].mxu0 %vm33_vm0, %v26_v20 }
  0x1d   :  { %647 = vmatprep.mubr.msk.f32.mxu0 %vm33_vm0, %v27_v21 }
  0x20   :  { %648 = vmatmul.mubr.msk.f32.gmra.mrb[12].mxu0 %vm33_vm0, %v28_v22 }
  0x21   :  { %650 = vmatprep.mubr.msk.f32.mxu0 %vm33_vm0, %v29_v23 }
  0x24   :  { %651 = vmatmul.mubr.msk.f32.gmra.mrb[14].mxu0 %vm33_vm0, %v30_v24 }
  0xdb   :  { %v831_v25 = vpop.f32.mrb[0].mxu0 }
  0xdc   :  { %v833_v26 = vpop.f32.mrb[1].mxu0 }
  0xdd   :  { %661 = vmatprep.mubr.msk.f32.mxu1 %vm231_vm1, %v833_v26 }
  0xde   :  { %662 = vmatmul.mubr.msk.f32.vlgmr.msra.gmra.mrb[0].mxu1 %vm231_vm1, %v831_v25 }
  0xdf   :  { %v839_v27 = vpop.f32.mrb[2].mxu0 }
  0xe0   :  { %v841_v28 = vpop.f32.mrb[3].mxu0 }
  0xe1   :  { %664 = vmatprep.mubr.msk.f32.mxu1 %vm231_vm1, %v841_v28 }
  0xe2   :  { %665 = vmatmul.mubr.msk.f32.gmra.mrb[2].mxu1 %vm231_vm1, %v839_v27 }
  0xe3   :  { %v847_v29 = vpop.f32.mrb[4].mxu0 }
  0xe4   :  { %v849_v30 = vpop.f32.mrb[5].mxu0 }
  0xe5   :  { %667 = vmatprep.mubr.msk.f32.mxu1 %vm231_vm1, %v849_v30 }
  0xe6   :  { %668 = vmatmul.mubr.msk.f32.gmra.mrb[4].mxu1 %vm231_vm1, %v847_v29 }
  0xe7   :  { %v855_v31 = vpop.f32.mrb[6].mxu0 }
  0xe8   :  { %v857_v32 = vpop.f32.mrb[7].mxu0 }
  0xe9   :  { %670 = vmatprep.mubr.msk.f32.mxu1 %vm231_vm1, %v857_v32 }
  0xea   :  { %671 = vmatmul.mubr.msk.f32.gmra.mrb[6].mxu1 %vm231_vm1, %v855_v31 }
  0xeb   :  { %v863_v33 = vpop.f32.mrb[8].mxu0 }
  0xec   :  { %v865_v34 = vpop.f32.mrb[9].mxu0 }
  0xed   :  { %673 = vmatprep.mubr.msk.f32.mxu1 %vm231_vm1, %v865_v34 }
  0xee   :  { %674 = vmatmul.mubr.msk.f32.gmra.mrb[8].mxu1 %vm231_vm1, %v863_v33 }
  0xef   :  { %v871_v35 = vpop.f32.mrb[10].mxu0 }
  0xf0   :  { %v873_v36 = vpop.f32.mrb[11].mxu0 }
  0xf1   :  { %676 = vmatprep.mubr.msk.f32.mxu1 %vm231_vm1, %v873_v36 }
  0xf2   :  { %677 = vmatmul.mubr.msk.f32.gmra.mrb[10].mxu1 %vm231_vm1, %v871_v35 }
  0xf3   :  { %v879_v37 = vpop.f32.mrb[12].mxu0 }
  0xf4   :  { %v881_v38 = vpop.f32.mrb[13].mxu0 }
  0xf5   :  { %679 = vmatprep.mubr.msk.f32.mxu1 %vm231_vm1, %v881_v38 }
  0xf6   :  { %680 = vmatmul.mubr.msk.f32.gmra.mrb[12].mxu1 %vm231_vm1, %v879_v37 }
  0xf7   :  { %v887_v39 = vpop.f32.mrb[14].mxu0 }
  0xf8   :  { %v889_v40 = vpop.f32.mrb[15].mxu0 }
  0xf9   :  { %682 = vmatprep.mubr.msk.f32.mxu1 %vm231_vm1, %v889_v40 }
  0xfa   :  { %683 = vmatmul.mubr.msk.f32.gmra.mrb[14].mxu1 %vm231_vm1, %v887_v39 }
 0x1b1   :  { %v663_v41 = vpop.f32.mrb[0].mxu1 }
 0x1b2   :  { %443 = vrot.lane.b32.xlu0 %v663_v41, %s725_s0  ;;  %v346_v42 = vpop.f32.mrb[1].mxu1 }
 0x1b5   :  { %v666_v43 = vpop.f32.mrb[2].mxu1 }
 0x1b6   :  { %441 = vrot.lane.b32.xlu0 %v346_v42, %s725_s0  ;;  %447 = vrot.lane.b32.xlu1 %v666_v43, %s725_s0  ;;  %v356_v44 = vpop.f32.mrb[3].mxu1 }
 0x1b9   :  { %v669_v45 = vpop.f32.mrb[4].mxu1 }
 0x1ba   :  { %445 = vrot.lane.b32.xlu1 %v356_v44, %s725_s0  ;;  %v366_v46 = vpop.f32.mrb[5].mxu1 }
 0x1bb   :  { %449 = vrot.lane.b32.xlu0 %v366_v46, %s725_s0 }
 0x1bd   :  { %v672_v47 = vpop.f32.mrb[6].mxu1 }
 0x1be   :  { %451 = vrot.lane.b32.xlu1 %v669_v45, %s725_s0  ;;  %v376_v48 = vpop.f32.mrb[7].mxu1 }
 0x1bf   :  { %453 = vrot.lane.b32.xlu0 %v376_v48, %s725_s0 }
 0x1c1   :  { %v675_v49 = vpop.f32.mrb[8].mxu1 }
 0x1c2   :  { %455 = vrot.lane.b32.xlu1 %v672_v47, %s725_s0  ;;  %v386_v50 = vpop.f32.mrb[9].mxu1 }
 0x1c3   :  { %457 = vrot.lane.b32.xlu0 %v386_v50, %s725_s0 }
 0x1c5   :  { %v678_v51 = vpop.f32.mrb[10].mxu1 }
 0x1c6   :  { %459 = vrot.lane.b32.xlu1 %v675_v49, %s725_s0  ;;  %v396_v52 = vpop.f32.mrb[11].mxu1 }
 0x1c7   :  { %461 = vrot.lane.b32.xlu0 %v396_v52, %s725_s0 }
 0x1c9   :  { %v681_v53 = vpop.f32.mrb[12].mxu1 }
 0x1ca   :  { %463 = vrot.lane.b32.xlu1 %v678_v51, %s725_s0  ;;  %v406_v54 = vpop.f32.mrb[13].mxu1 }
 0x1cb   :  { %465 = vrot.lane.b32.xlu0 %v406_v54, %s725_s0 }
 0x1cd   :  { %v684_v55 = vpop.f32.mrb[14].mxu1 }
 0x1ce   :  { %467 = vrot.lane.b32.xlu1 %v681_v53, %s725_s0  ;;  %v416_v56 = vpop.f32.mrb[15].mxu1 }
 0x1cf   :  { %469 = vrot.lane.b32.xlu0 %v416_v56, %s725_s0 }
 0x1d2   :  { %471 = vrot.lane.b32.xlu1 %v684_v55, %s725_s0 }
 0x224   :  { %v444_v57 = vpop.permute.xlu0 %443 }
 0x225   :  { %v491_v58 = vsel %vm489_vm2, %v831_v25, %v444_v57 }
 0x226   :  { %v508_v59 = vsel %vm506_vm3, %v491_v58, 0.0 }
 0x227   :  { %524 = vst [vmem:[#allocation2 + $0x8] sm:$0xff] %v508_v59 }
 0x228   :  { %v442_v60 = vpop.permute.xlu0 %441  ;;  %v448_v61 = vpop.permute.xlu1 %447 }
 0x229   :  { %v490_v62 = vsel %vm489_vm2, %v833_v26, %v442_v60  ;;  %v493_v63 = vsel %vm489_vm2, %v839_v27, %v448_v61 }
 0x22a   :  { %v507_v0 = vsel %vm506_vm3, %v490_v62, 0.0  ;;  %v510_v1 = vsel %vm506_vm3, %v493_v63, 0.0 }
 0x22b   :  { %523 = vst [vmem:[#allocation2] sm:$0xff] %v507_v0  ;;  %526 = vst [vmem:[#allocation2 + $0x18] sm:$0xff] %v510_v1 }
 0x22c   :  { %v446_v2 = vpop.permute.xlu1 %445 }
 0x22d   :  { %v492_v3 = vsel %vm489_vm2, %v841_v28, %v446_v2  ;;  %v450_v4 = vpop.permute.xlu0 %449 }
 0x22e   :  { %v509_v5 = vsel %vm506_vm3, %v492_v3, 0.0  ;;  %v494_v6 = vsel %vm489_vm2, %v849_v30, %v450_v4 }
 0x22f   :  { %525 = vst [vmem:[#allocation2 + $0x10] sm:$0xff] %v509_v5  ;;  %v511_v7 = vsel %vm506_vm3, %v494_v6, 0.0 }
 0x230   :  { %527 = vst [vmem:[#allocation2 + $0x20] sm:$0xff] %v511_v7  ;;  %v452_v8 = vpop.permute.xlu1 %451 }
 0x231   :  { %v495_v9 = vsel %vm489_vm2, %v847_v29, %v452_v8  ;;  %v454_v10 = vpop.permute.xlu0 %453 }
 0x232   :  { %v512_v11 = vsel %vm506_vm3, %v495_v9, 0.0  ;;  %v496_v12 = vsel %vm489_vm2, %v857_v32, %v454_v10 }
 0x233   :  { %528 = vst [vmem:[#allocation2 + $0x28] sm:$0xff] %v512_v11  ;;  %v513_v13 = vsel %vm506_vm3, %v496_v12, 0.0 }
 0x234   :  { %529 = vst [vmem:[#allocation2 + $0x30] sm:$0xff] %v513_v13  ;;  %v456_v14 = vpop.permute.xlu1 %455 }
 0x235   :  { %v497_v15 = vsel %vm489_vm2, %v855_v31, %v456_v14  ;;  %v458_v16 = vpop.permute.xlu0 %457 }
 0x236   :  { %v514_v17 = vsel %vm506_vm3, %v497_v15, 0.0  ;;  %v498_v18 = vsel %vm489_vm2, %v865_v34, %v458_v16 }
 0x237   :  { %530 = vst [vmem:[#allocation2 + $0x38] sm:$0xff] %v514_v17  ;;  %v515_v19 = vsel %vm506_vm3, %v498_v18, 0.0 }
 0x238   :  { %531 = vst [vmem:[#allocation2 + $0x40] sm:$0xff] %v515_v19  ;;  %v460_v20 = vpop.permute.xlu1 %459 }
 0x239   :  { %v499_v21 = vsel %vm489_vm2, %v863_v33, %v460_v20  ;;  %v462_v22 = vpop.permute.xlu0 %461 }
 0x23a   :  { %v516_v23 = vsel %vm506_vm3, %v499_v21, 0.0  ;;  %v500_v24 = vsel %vm489_vm2, %v873_v36, %v462_v22 }
 0x23b   :  { %532 = vst [vmem:[#allocation2 + $0x48] sm:$0xff] %v516_v23  ;;  %v517_v25 = vsel %vm506_vm3, %v500_v24, 0.0 }
 0x23c   :  { %533 = vst [vmem:[#allocation2 + $0x50] sm:$0xff] %v517_v25  ;;  %v464_v26 = vpop.permute.xlu1 %463 }
 0x23d   :  { %v501_v27 = vsel %vm489_vm2, %v871_v35, %v464_v26  ;;  %v466_v28 = vpop.permute.xlu0 %465 }
 0x23e   :  { %v518_v29 = vsel %vm506_vm3, %v501_v27, 0.0  ;;  %v502_v30 = vsel %vm489_vm2, %v881_v38, %v466_v28 }
 0x23f   :  { %534 = vst [vmem:[#allocation2 + $0x58] sm:$0xff] %v518_v29  ;;  %v519_v31 = vsel %vm506_vm3, %v502_v30, 0.0 }
 0x240   :  { %535 = vst [vmem:[#allocation2 + $0x60] sm:$0xff] %v519_v31  ;;  %v468_v32 = vpop.permute.xlu1 %467 }
 0x241   :  { %v503_v33 = vsel %vm489_vm2, %v879_v37, %v468_v32  ;;  %v470_v34 = vpop.permute.xlu0 %469 }
 0x242   :  { %v520_v36 = vsel %vm506_vm3, %v503_v33, 0.0  ;;  %v504_v35 = vsel %vm489_vm2, %v889_v40, %v470_v34 }
 0x243   :  { %536 = vst [vmem:[#allocation2 + $0x68] sm:$0xff] %v520_v36  ;;  %v521_v41 = vsel %vm506_vm3, %v504_v35, 0.0 }
 0x244   :  { %537 = vst [vmem:[#allocation2 + $0x70] sm:$0xff] %v521_v41  ;;  %v472_v38 = vpop.permute.xlu1 %471 }
 0x245   :  { %v505_v42 = vsel %vm489_vm2, %v887_v39, %v472_v38 }
 0x246   :  { %v522_v43 = vsel %vm506_vm3, %v505_v42, 0.0 }
 0x247   :  { %538 = vst [vmem:[#allocation2 + $0x78] sm:$0xff] %v522_v43 }
 0x248   :  { %712 = shalt.err (!%p709_p4)
}
 0x249   :  { %s713_s4 = scalar_lea.hbm %s974_s3, 2048 }
 0x24a   :  { %p714_p5 = scmp.ne.s32.totalorder %s974_s3, %s713_s4  ;;  %p717_p6 = scmp.lt.u32.totalorder %s713_s4, %s974_s3 }
 0x24c   :  { %p719_p7 = pnand %p717_p6, %p714_p5 }
 0x24e   :  { %722 = shalt.err (!%p719_p7)
}
 0x24f   :  { %s727_s8 = smov 128   ;;  %s728_s9 = smov 8  }
 0x250   :  { %550 = dma.vmem_to_hbm [thread:$0]  %s545_s27, 2048, %s974_s3, [#allocation3], %s727_s8, %s727_s8, %s728_s9  }
 0x251   :  { %723 = dma.done.wait [#allocation3], 2048  }
 0x252   :  { %724 = vsyncadd [#allocation3], 4294965248 }
 0x253   :  { %554 = vsyncpa [#allocation3], 1 }

</bundles_post_ra>
